<compile_context>
chip_gen: v5e
topology: v5e:2x2
jax: 0.10.0
libtpu: 0.0.40
codegen_flags: <defaults>
</compile_context>

<pallas_src>
import jax
import jax.numpy as jnp
from jax.experimental import pallas as pl
from jax.experimental.pallas import tpu as pltpu


# ----------------------------- Pallas kernel -------------------------------

def pad_and_split_kernel(x_ref, cat_ref, s0_ref, s1_ref, s2_ref, s3_ref, s4_ref):
    """ConstantPad1d(3, 0.0) on the last dim, fused with the per-channel splits.

    x_ref:   (N, 5, L)
    cat_ref: (N, 5, L+6)  == torch.cat(torch.split(pad(x0), [1]*5, dim=1), dim=1)
    s*_ref:  (N, 1, L+6)  == torch.split(pad(x0), [1]*5, dim=1)
    """
    n, c, l = x_ref.shape
    x = x_ref[...]

    # Build the padded output with exactly one store per element: zero the two pad
    # windows, then place the input into the center window.
    zpad = jnp.zeros((n, c, 3), dtype=x.dtype)
    cat_ref[:, :, :3] = zpad
    cat_ref[:, :, 3 + l:] = zpad
    cat_ref[:, :, 3:3 + l] = x

    # Read the fully-built padded tile back from VMEM (cheap vld) and emit the five
    # channel splits as one sublane-sliced store each — no extra XLA slice ops,
    # no second launch, no re-read of HBM.
    padded = cat_ref[...]
    split_refs = (s0_ref, s1_ref, s2_ref, s3_ref, s4_ref)
    for i, s_ref in enumerate(split_refs):
        s_ref[...] = padded[:, i:i + 1, :]


# ------------------------------ Wrapper glue -------------------------------

_VMEM_SPEC = pl.BlockSpec(memory_space=pltpu.MemorySpace.VMEM)


def model_forward(x0):
    """x0: (N, 5, 3) f32 -> (concatenated (N,5,9), tuple of five (N,1,9))."""
    n, c, l = x0.shape
    assert c == 5 and l == 3, "module semantics require x0 of shape (N, 5, 3)"

    # Linear(3,8)+Sigmoid is intentionally omitted: its result (x4) is discarded in the
    # PyTorch forward and has no side effects, so the returned values are identical.

    # TODO(synk): if this is ever generalized to large batch N, add grid=(pl.cdiv(N, TN),)
    # with batch-tiled BlockSpecs and dimension_semantics=("parallel",) (v7x: 64 MiB VMEM,
    # 2 TCs), and fold batch into the sublane axis for store density. Irrelevant at N=2.

    out_len = l + 6
    out_shape = (
        jax.ShapeDtypeStruct((n, c, out_len), x0.dtype),       # concatenated
    ) + tuple(
        jax.ShapeDtypeStruct((n, 1, out_len), x0.dtype) for _ in range(c)  # 5 splits
    )

    outs = pl.pallas_call(
        pad_and_split_kernel,
        out_shape=out_shape,
        in_specs=[_VMEM_SPEC],
        out_specs=tuple(_VMEM_SPEC for _ in range(1 + c)),
    )(x0)

    concatenated = outs[0]
    splits = tuple(outs[1:])
    return concatenated, splits


# --------------------------------- Driver ----------------------------------

if __name__ == "__main__":
    key = jax.random.PRNGKey(0)
    k_x, _ = jax.random.split(key, 2)

    # Small deterministic shape implied by the module: batch=2, channels=5, length=3.
    x0 = jax.random.normal(k_x, (2, 5, 3), dtype=jnp.float32)

    concatenated, splits = model_forward(x0)
    jax.block_until_ready(concatenated)
    jax.block_until_ready(splits)

    # Sanity checks against a plain-JAX reference of the returned values.
    ref_pad = jnp.pad(x0, ((0, 0), (0, 0), (3, 3)))
    assert concatenated.shape == (2, 5, 9)
    assert len(splits) == 5 and all(s.shape == (2, 1, 9) for s in splits)
    assert jnp.allclose(concatenated, ref_pad)
    assert jnp.allclose(jnp.concatenate(splits, axis=1), ref_pad)
    for i in range(5):
        assert jnp.allclose(splits[i], ref_pad[:, i:i + 1, :])

    print("KERNEL_OK")
</pallas_src>

<mosaic_0001>
module attributes {stable_mosaic.version = 11 : i64} {
  func.func @pad_and_split_kernel(%arg0: memref<2x5x3xf32, #tpu.memory_space<vmem>>, %arg1: memref<2x5x9xf32, #tpu.memory_space<vmem>>, %arg2: memref<2x1x9xf32, #tpu.memory_space<vmem>>, %arg3: memref<2x1x9xf32, #tpu.memory_space<vmem>>, %arg4: memref<2x1x9xf32, #tpu.memory_space<vmem>>, %arg5: memref<2x1x9xf32, #tpu.memory_space<vmem>>, %arg6: memref<2x1x9xf32, #tpu.memory_space<vmem>>) attributes {dimension_semantics = [], scalar_prefetch = 0 : i64, scratch_operands = 0 : i64, tpu.core_type = #tpu.core_type<tc>} {
    %c0 = arith.constant 0 : index
    %c0_0 = arith.constant 0 : index
    %c0_1 = arith.constant 0 : index
    %0 = vector.load %arg0[%c0, %c0_0, %c0_1] : memref<2x5x3xf32, #tpu.memory_space<vmem>>, vector<2x5x3xf32>
    %cst = arith.constant 0.000000e+00 : f32
    %1 = vector.broadcast %cst : f32 to vector<2x5x3xf32>
    %c0_2 = arith.constant 0 : index
    %c0_3 = arith.constant 0 : index
    %c0_4 = arith.constant 0 : index
    %2 = vector.load %arg1[%c0_2, %c0_3, %c0_4] : memref<2x5x9xf32, #tpu.memory_space<vmem>>, vector<2x5x3xf32>
    tpu.vector_store %arg1[%c0_2, %c0_3, %c0_4], %1 {strides = array<i32>} : memref<2x5x9xf32, #tpu.memory_space<vmem>>, vector<2x5x3xf32>,
    %c0_5 = arith.constant 0 : index
    %c0_6 = arith.constant 0 : index
    %c6 = arith.constant 6 : index
    %3 = vector.load %arg1[%c0_5, %c0_6, %c6] : memref<2x5x9xf32, #tpu.memory_space<vmem>>, vector<2x5x3xf32>
    tpu.vector_store %arg1[%c0_5, %c0_6, %c6], %1 {strides = array<i32>} : memref<2x5x9xf32, #tpu.memory_space<vmem>>, vector<2x5x3xf32>,
    %c0_7 = arith.constant 0 : index
    %c0_8 = arith.constant 0 : index
    %c3 = arith.constant 3 : index
    %4 = vector.load %arg1[%c0_7, %c0_8, %c3] : memref<2x5x9xf32, #tpu.memory_space<vmem>>, vector<2x5x3xf32>
    tpu.vector_store %arg1[%c0_7, %c0_8, %c3], %0 {strides = array<i32>} : memref<2x5x9xf32, #tpu.memory_space<vmem>>, vector<2x5x3xf32>,
    %c0_9 = arith.constant 0 : index
    %c0_10 = arith.constant 0 : index
    %c0_11 = arith.constant 0 : index
    %5 = vector.load %arg1[%c0_9, %c0_10, %c0_11] : memref<2x5x9xf32, #tpu.memory_space<vmem>>, vector<2x5x9xf32>
    %6 = vector.extract_strided_slice %5 {offsets = [0, 0, 0], sizes = [2, 1, 9], strides = [1, 1, 1]} : vector<2x5x9xf32> to vector<2x1x9xf32>
    %c0_12 = arith.constant 0 : index
    %c0_13 = arith.constant 0 : index
    %c0_14 = arith.constant 0 : index
    %7 = vector.load %arg2[%c0_12, %c0_13, %c0_14] : memref<2x1x9xf32, #tpu.memory_space<vmem>>, vector<2x1x9xf32>
    tpu.vector_store %arg2[%c0_12, %c0_13, %c0_14], %6 {strides = array<i32>} : memref<2x1x9xf32, #tpu.memory_space<vmem>>, vector<2x1x9xf32>,
    %8 = vector.extract_strided_slice %5 {offsets = [0, 1, 0], sizes = [2, 1, 9], strides = [1, 1, 1]} : vector<2x5x9xf32> to vector<2x1x9xf32>
    %c0_15 = arith.constant 0 : index
    %c0_16 = arith.constant 0 : index
    %c0_17 = arith.constant 0 : index
    %9 = vector.load %arg3[%c0_15, %c0_16, %c0_17] : memref<2x1x9xf32, #tpu.memory_space<vmem>>, vector<2x1x9xf32>
    tpu.vector_store %arg3[%c0_15, %c0_16, %c0_17], %8 {strides = array<i32>} : memref<2x1x9xf32, #tpu.memory_space<vmem>>, vector<2x1x9xf32>,
    %10 = vector.extract_strided_slice %5 {offsets = [0, 2, 0], sizes = [2, 1, 9], strides = [1, 1, 1]} : vector<2x5x9xf32> to vector<2x1x9xf32>
    %c0_18 = arith.constant 0 : index
    %c0_19 = arith.constant 0 : index
    %c0_20 = arith.constant 0 : index
    %11 = vector.load %arg4[%c0_18, %c0_19, %c0_20] : memref<2x1x9xf32, #tpu.memory_space<vmem>>, vector<2x1x9xf32>
    tpu.vector_store %arg4[%c0_18, %c0_19, %c0_20], %10 {strides = array<i32>} : memref<2x1x9xf32, #tpu.memory_space<vmem>>, vector<2x1x9xf32>,
    %12 = vector.extract_strided_slice %5 {offsets = [0, 3, 0], sizes = [2, 1, 9], strides = [1, 1, 1]} : vector<2x5x9xf32> to vector<2x1x9xf32>
    %c0_21 = arith.constant 0 : index
    %c0_22 = arith.constant 0 : index
    %c0_23 = arith.constant 0 : index
    %13 = vector.load %arg5[%c0_21, %c0_22, %c0_23] : memref<2x1x9xf32, #tpu.memory_space<vmem>>, vector<2x1x9xf32>
    tpu.vector_store %arg5[%c0_21, %c0_22, %c0_23], %12 {strides = array<i32>} : memref<2x1x9xf32, #tpu.memory_space<vmem>>, vector<2x1x9xf32>,
    %14 = vector.extract_strided_slice %5 {offsets = [0, 4, 0], sizes = [2, 1, 9], strides = [1, 1, 1]} : vector<2x5x9xf32> to vector<2x1x9xf32>
    %c0_24 = arith.constant 0 : index
    %c0_25 = arith.constant 0 : index
    %c0_26 = arith.constant 0 : index
    %15 = vector.load %arg6[%c0_24, %c0_25, %c0_26] : memref<2x1x9xf32, #tpu.memory_space<vmem>>, vector<2x1x9xf32>
    tpu.vector_store %arg6[%c0_24, %c0_25, %c0_26], %14 {strides = array<i32>} : memref<2x1x9xf32, #tpu.memory_space<vmem>>, vector<2x1x9xf32>,
    return
  }
}

</mosaic_0001>

<bundles_post_ra>
// kernel: tpu_custom_call.1
= control target key start
LH: loop header
LB: loop body
LE: loop exit
PB: predicated region body
PF: predicated region fallthrough
CT: control target
= control target key end

     0   :  { %12 = vsyncpa [#allocation3], 0  ;;  %s395_s0 = inlined_call_operand.vmem [shape: f32[2,5,3], index: 0, kind: input, shape index: {}]   ;;  %s396_s1 = inlined_call_operand.vmem [shape: f32[2,5,9], index: 1, kind: output, shape index: {0}]   ;;  %s397_s2 = inlined_call_operand.hbm [shape: f32[2,1,9], index: 2, kind: output, shape index: {1}]   ;;  %s398_s3 = inlined_call_operand.hbm [shape: f32[2,1,9], index: 3, kind: output, shape index: {2}]   ;;  %s399_s4 = inlined_call_operand.hbm [shape: f32[2,1,9], index: 4, kind: output, shape index: {3}]   ;;  %s400_s5 = inlined_call_operand.hbm [shape: f32[2,1,9], index: 5, kind: output, shape index: {4}]   ;;  %s401_s6 = inlined_call_operand.hbm [shape: f32[2,1,9], index: 6, kind: output, shape index: {5}]  }
   0x1   :  { %13 = vsyncpa [#allocation5], 0  ;;  %v17_v0 = vld [vmem:[%s395_s0] sm:$0x1f]  ;;  %vm19_vm0 = vcmask 20480   ;;  %s280_s23 = smov 3  }
   0x2   :  { %27 = vrot.lane.b32.xlu0 %v17_v0, %s280_s23  ;;  %vm22_vm1 = vcmask 69680  }
   0x3   :  { %14 = vsyncpa [#allocation8], 0  ;;  %v281_v1 = vmov 0.0   ;;  %v18_v2 = vld [vmem:[%s395_s0 + $0x8] sm:$0x1f]  ;;  %vm33_vm2 = vcmask 45080  }
   0x4   :  { %20 = vst.msk [vmem:[%s396_s1] sm:$0x1f] %vm19_vm0, %v281_v1  ;;  %s282_s12 = smov [#allocation4]   ;;  %s74_s16 = sshll.u32 %s398_s3, 4  ;;  %vm41_vm3 = vcmask 66561   ;;  %vm47_vm4 = vcmask 68611   ;;  %s362_s16 = int_to_ptr.hbm [resolvable:$true] %s74_s16 }
   0x5   :  { %23 = vst.msk [vmem:[%s396_s1] sm:$0x1f] %vm22_vm1, %v281_v1  ;;  %s345_s13 = sshll.u32 %s282_s12, 4  ;;  %s100_s0 = sshll.u32 %s400_s5, 4  ;;  %vm38_vm5 = vcmask 65536   ;;  %vm44_vm6 = vcmask 67586   ;;  %s73_s13 = int_to_ptr.vmem [resolvable:$true] %s345_s13  ;;  %s365_s0 = int_to_ptr.hbm [resolvable:$true] %s100_s0 }
   0x6   :  { %21 = vst.msk [vmem:[%s396_s1 + $0x8] sm:$0x1f] %vm19_vm0, %v281_v1  ;;  %s283_s21 = smov [#allocation7]   ;;  %vm50_vm7 = vcmask 69636   ;;  %s284_s3 = smov [#allocation2]  }
   0x7   :  { %24 = vst.msk [vmem:[%s396_s1 + $0x8] sm:$0x1f] %vm22_vm1, %v281_v1  ;;  %s357_s22 = sshll.u32 %s283_s21, 4  ;;  %s59_s5 = sshll.u32 %s284_s3, 4  ;;  %s99_s22 = int_to_ptr.vmem [resolvable:$true] %s357_s22  ;;  %s60_s5 = int_to_ptr.vmem [resolvable:$true] %s59_s5 }
   0x8   :  { %s61_s27 = sshll.u32 %s397_s2, 4  ;;  %s285_s28 = smov [#allocation6]   ;;  %s62_s27 = int_to_ptr.hbm [resolvable:$true] %s61_s27 }
   0x9   :  { %s85_s29 = sshll.u32 %s285_s28, 4  ;;  %s87_s8 = sshll.u32 %s399_s4, 4  ;;  %s86_s29 = int_to_ptr.vmem [resolvable:$true] %s85_s29  ;;  %s88_s8 = int_to_ptr.hbm [resolvable:$true] %s87_s8 }
   0xa   :  { %29 = vrot.lane.b32.xlu0 %v18_v2, %s280_s23  ;;  %s286_s9 = smov [#allocation9]   ;;  %s113_s2 = sshll.u32 %s401_s6, 4  ;;  %s114_s2 = int_to_ptr.hbm [resolvable:$true] %s113_s2 }
   0xb   :  { %s111_s10 = sshll.u32 %s286_s9, 4  ;;  %s287_s4 = smov 16   ;;  %s112_s10 = int_to_ptr.vmem [resolvable:$true] %s111_s10 }
   0xc   :  { %s288_s17 = smov 1  }
  0x74   :  { %v28_v3 = vpop.permute.xlu0 %27 }
  0x75   :  { %34 = vst.msk [vmem:[%s396_s1] sm:$0x1f] %vm33_vm2, %v28_v3 }
  0x7c   :  { %v30_v4 = vpop.permute.xlu0 %29  ;;  %v36_v5 = vld [vmem:[%s396_s1] sm:$0x1f] }
  0x7d   :  { %35 = vst.msk [vmem:[%s396_s1 + $0x8] sm:$0x1f] %vm33_vm2, %v30_v4 }
  0x7e   :  { %42 = vst.msk [vmem:[#allocation4 - $0x1] sm:$0x2] %vm41_vm3, %v36_v5 }
  0x7f   :  { %48 = vst.msk [vmem:[#allocation7 - $0x3] sm:$0x8] %vm47_vm4, %v36_v5 }
  0x80   :  { %39 = vst.msk [vmem:[#allocation2] sm:$0x1] %vm38_vm5, %v36_v5 }
  0x81   :  { %45 = vst.msk [vmem:[#allocation6 - $0x2] sm:$0x4] %vm44_vm6, %v36_v5 }
  0x82   :  { %51 = vst.msk [vmem:[#allocation9 - $0x4] sm:$0x10] %vm50_vm7, %v36_v5 }
  0x84   :  { %v37_v6 = vld [vmem:[%s396_s1 + $0x8] sm:$0x1f] }
  0x85   :  { %43 = vst.msk [vmem:[#allocation4] sm:$0x2] %vm41_vm3, %v37_v6 }
  0x86   :  { %80 = dma.vmem_to_hbm [thread:$0]  %s73_s13, 32, %s362_s16, [#allocation5], %s287_s4, %s287_s4, %s288_s17   ;;  %49 = vst.msk [vmem:[#allocation7 - $0x2] sm:$0x8] %vm47_vm4, %v37_v6 }
  0x87   :  { %106 = dma.vmem_to_hbm [thread:$0]  %s99_s22, 32, %s365_s0, [#allocation8], %s287_s4, %s287_s4, %s288_s17   ;;  %40 = vst.msk [vmem:[#allocation2 + $0x1] sm:$0x1] %vm38_vm5, %v37_v6 }
  0x88   :  { %67 = dma.vmem_to_hbm [thread:$0]  %s60_s5, 32, %s62_s27, [#allocation3], %s287_s4, %s287_s4, %s288_s17   ;;  %46 = vst.msk [vmem:[#allocation6 - $0x1] sm:$0x4] %vm44_vm6, %v37_v6 }
  0x89   :  { %93 = dma.vmem_to_hbm [thread:$0]  %s86_s29, 32, %s88_s8, [#allocation5], %s287_s4, %s287_s4, %s288_s17   ;;  %52 = vst.msk [vmem:[#allocation9 - $0x3] sm:$0x10] %vm50_vm7, %v37_v6 }
  0x8a   :  { %119 = dma.vmem_to_hbm [thread:$0]  %s112_s10, 32, %s114_s2, [#allocation8], %s287_s4, %s287_s4, %s288_s17  }
  0x8b   :  { %274 = dma.done.wait [#allocation3], 32  }
  0x8c   :  { %275 = vsyncadd [#allocation3], 4294967264 }
  0x8d   :  { %276 = dma.done.wait [#allocation5], 64  }
  0x8e   :  { %277 = vsyncadd [#allocation5], 4294967232 }
  0x8f   :  { %278 = dma.done.wait [#allocation8], 64  }
  0x90   :  { %279 = vsyncadd [#allocation8], 4294967232 }
  0x91   :  { %142 = vsyncpa [#allocation3], 1 }
  0x92   :  { %143 = vsyncpa [#allocation5], 1 }
  0x93   :  { %144 = vsyncpa [#allocation8], 1 }

</bundles_post_ra>
